<compile_context>
chip_gen: v7x
topology: tpu7x:2x2x1
jax: 0.10.0
libtpu: 0.0.40
codegen_flags: <defaults>
</compile_context>

<pallas_src>
import functools

import numpy as np
import jax
import jax.numpy as jnp
from jax.experimental import pallas as pl
from jax.experimental.pallas import tpu as pltpu

LOG2 = float(np.log(2.0))          # Softplus beta used by the reference model
VMEM_LIMIT = 32 * 1024 * 1024      # well under v7x's 64 MiB/TC; plenty here


# ---------------------------------------------------------------------------
# In-kernel math helpers
# ---------------------------------------------------------------------------
def _silu(x):
    return x * jax.nn.sigmoid(x)


def _softplus_beta(x):
    # torch.nn.Softplus(beta=ln(2), threshold=20)
    bx = LOG2 * x
    return jnp.where(bx > 20.0, x, jnp.log1p(jnp.exp(jnp.minimum(bx, 20.0))) / LOG2)


def _gn_silu(x, gamma, beta, A):
    """GroupNorm (eps=1e-5, biased variance) + SiLU on an (HW, C) fp32 tile.

    Group averaging of the per-channel stats is a tiny (1,C)x(C,C) matmul.
    The per-channel scale is computed once on the (1,C) row (no extra full-
    tile VPU multiply)."""
    mu = jnp.dot(jnp.mean(x, axis=0, keepdims=True), A,
                 preferred_element_type=jnp.float32)
    d = x - mu
    var = jnp.dot(jnp.mean(d * d, axis=0, keepdims=True), A,
                  preferred_element_type=jnp.float32)
    scale = jax.lax.rsqrt(var + 1e-5) * gamma          # (1,C)
    return _silu(d * scale + beta)


def _conv_same(x, w_ref, *, k, W, lead, pad_ref, col_ref, zero_halo=True):
    """'same' k x k conv of an (HW, C) fp32 tile as ONE im2col MXU matmul.

    Pixel p of x lives at row `lead + p` of the flat pad scratch (lead is the
    sublane-aligned zero halo); tap (di,dj) is the contiguous row window
    starting at lead + (di-1)*W + (dj-1).  Column wrap-around for off-centre
    dj taps is killed with iota masks.  Taps are written as bf16 column
    blocks of the (HW, k*k*C) im2col scratch and the conv collapses to a
    single K = k*k*C matmul with fp32 accumulation (no bias added here)."""
    HW, C = x.shape
    if k == 1:
        return jnp.dot(x.astype(jnp.bfloat16), w_ref[...],
                       preferred_element_type=jnp.float32)
    rows = pad_ref.shape[0]
    if zero_halo:
        # zero only the halo rows; the interior is fully overwritten below
        pad_ref[0:lead, :] = jnp.zeros((lead, C), pad_ref.dtype)
        pad_ref[lead + HW:rows, :] = jnp.zeros((rows - lead - HW, C), pad_ref.dtype)
    pad_ref[lead:lead + HW, :] = x
    pix = jax.lax.broadcasted_iota(jnp.int32, (HW, 1), 0)
    col_id = (pix & (W - 1)) if (W & (W - 1)) == 0 else (pix % W)
    not_left = col_id != 0
    not_right = col_id != (W - 1)
    c0 = (k - 1) // 2
    for di in range(k):
        for dj in range(k):
            t = di * k + dj
            start = lead + (di - c0) * W + (dj - c0)
            tap = pad_ref[start:start + HW, :]
            if dj < c0:
                tap = jnp.where(not_left, tap, 0.0)
            elif dj > c0:
                tap = jnp.where(not_right, tap, 0.0)
            col_ref[:, t * C:(t + 1) * C] = tap.astype(col_ref.dtype)
    return jnp.dot(col_ref[...], w_ref[...], preferred_element_type=jnp.float32)


# ---------------------------------------------------------------------------
# Whole-Block fused kernel:
#   [prologue: h + p_feat + z_proj(z)]  or  [concat of input parts]
#   -> GN1 -> SiLU -> conv1  (+bias, + SiLU->Linear(pa))
#   -> GN2 -> SiLU -> (Dropout: identity) -> conv2 (+bias)
#   -> + identity / 1x1-conv skip
# ---------------------------------------------------------------------------
def _block_kernel(*refs, k, W, lead, n_parts, has_pa, skip, prologue):
    it = iter(refs)
    if prologue:
        h_ref = next(it)
        pf_ref = next(it)
        z_ref = next(it)
        zw_ref = next(it)
        zb_ref = next(it)
    else:
        x_refs = [next(it) for _ in range(n_parts)]
    gn1, w1 = [], []
    for _ in range(n_parts):
        gn1.append((next(it), next(it), next(it)))
        w1.append(next(it))
    b1_ref = next(it)
    if has_pa:
        pa_ref, paw_ref, pab_ref = next(it), next(it), next(it)
    g2_ref, be2_ref, A2_ref = next(it), next(it), next(it)
    w2_ref, b2_ref = next(it), next(it)
    if skip == "conv":
        sw_ref, sb_ref = next(it), next(it)
    o_ref = next(it)
    if k > 1:
        pad_a, col_a, pad_b, col_b = next(it), next(it), next(it), next(it)
    else:
        pad_a = col_a = pad_b = col_b = None

    # ---- block input (per part), fp32 ------------------------------------
    if prologue:
        xs = [h_ref[...].astype(jnp.float32) + pf_ref[...].astype(jnp.float32)
              + jnp.dot(z_ref[...].astype(jnp.bfloat16), zw_ref[...],
                        preferred_element_type=jnp.float32) + zb_ref[...]]
    else:
        xs = [r[...].astype(jnp.float32) for r in x_refs]

    # ---- GN1 -> SiLU -> conv1  (+bias, +pa) -------------------------------
    extra = b1_ref[...]
    if has_pa:
        extra = extra + (jnp.dot(_silu(pa_ref[...]), paw_ref[...],
                                 preferred_element_type=jnp.float32) + pab_ref[...])
    h1 = None
    for j in range(n_parts):
        g_ref, be_ref, A_ref = gn1[j]
        a = _gn_silu(xs[j], g_ref[...], be_ref[...], A_ref[...])
        y = _conv_same(a, w1[j], k=k, W=W, lead=lead,
                       pad_ref=pad_a, col_ref=col_a, zero_halo=(j == 0))
        h1 = y if h1 is None else h1 + y
    h1 = h1 + extra

    # ---- GN2 -> SiLU -> conv2 (+bias) -------------------------------------
    # TODO(synk): nn.Dropout(p=args.p_dropout) is identity here (inference / p=0).
    a2 = _gn_silu(h1, g2_ref[...], be2_ref[...], A2_ref[...])
    out = _conv_same(a2, w2_ref, k=k, W=W, lead=lead,
                     pad_ref=pad_b, col_ref=col_b) + b2_ref[...]

    # ---- residual ----------------------------------------------------------
    if skip == "id":
        out = out + xs[0]
    elif skip == "conv":
        out = out + (jnp.dot(xs[0].astype(jnp.bfloat16), sw_ref[...],
                             preferred_element_type=jnp.float32) + sb_ref[...])
    o_ref[...] = out.astype(o_ref.dtype)


def fused_block(p, x_parts=None, pa=None, prologue=None, out_dtype=jnp.float32):
    """One Block.forward as a single pallas_call (grid over batch, 'parallel').

    x_parts : list of NHWC tensors forming the (channel-concatenated) input.
    prologue: optional (h, p_feat, z, z_proj_w, z_proj_b); the block input is
              then h + p_feat + z_proj(z), computed entirely in VMEM.
    """
    k = p["k"]
    assert k in (1, 3)
    if prologue is not None:
        h, pf, z, zw, zb = prologue
        N, H, W, _ = h.shape
    else:
        N, H, W, _ = x_parts[0].shape
    HW = H * W
    part_cs = list(p["part_c"])
    n_parts = len(part_cs)
    B, Cout = p["bneck"], p["cout"]
    has_pa, skip = p["condition"], p["skip"]

    inputs, specs = [], []

    def add_batch(a):                       # per-batch-element (N, HW, C) tiles
        a = a.reshape(N, HW, a.shape[-1])
        inputs.append(a)
        specs.append(pl.BlockSpec((None, HW, a.shape[-1]), lambda n: (n, 0, 0)))

    def add_shared(a):                      # whole-array weights / GN params
        inputs.append(a)
        specs.append(pl.BlockSpec(a.shape, lambda n: (0,) * a.ndim))

    if prologue is not None:
        add_batch(h)
        add_batch(pf)
        add_batch(z)
        add_shared(zw)
        add_shared(zb)
    else:
        assert len(x_parts) == n_parts
        for a in x_parts:
            add_batch(a)
    for j in range(n_parts):
        add_shared(p["gn1_gamma"][j])
        add_shared(p["gn1_beta"][j])
        add_shared(p["gn1_A"][j])
        add_shared(p["conv1_w"][j])
    add_shared(p["conv1_b"])
    if has_pa:
        E = pa.shape[-1]
        inputs.append(pa.reshape(N, 1, E))
        specs.append(pl.BlockSpec((None, 1, E), lambda n: (n, 0, 0)))
        add_shared(p["pa_w"])
        add_shared(p["pa_b"])
    add_shared(p["gn2_gamma"])
    add_shared(p["gn2_beta"])
    add_shared(p["gn2_A"])
    add_shared(p["conv2_w"])
    add_shared(p["conv2_b"])
    if skip == "conv":
        add_shared(p["skip_w"])
        add_shared(p["skip_b"])

    scratch, lead = [], 0
    if k > 1:
        assert all(c == part_cs[0] for c in part_cs)
        lead = -(-(W + 1) // 8) * 8          # sublane-aligned zero halo
        rows = lead + HW + lead
        scratch = [pltpu.VMEM((rows, part_cs[0]), jnp.float32),
                   pltpu.VMEM((HW, k * k * part_cs[0]), jnp.bfloat16),
                   pltpu.VMEM((rows, B), jnp.float32),
                   pltpu.VMEM((HW, k * k * B), jnp.bfloat16)]

    kern = functools.partial(_block_kernel, k=k, W=W, lead=lead, n_parts=n_parts,
                             has_pa=has_pa, skip=skip, prologue=prologue is not None)
    out = pl.pallas_call(
        kern,
        out_shape=jax.ShapeDtypeStruct((N, HW, Cout), out_dtype),
        grid=(N,),
        in_specs=specs,
        out_specs=pl.BlockSpec((None, HW, Cout), lambda n: (n, 0, 0)),
        scratch_shapes=scratch,
        compiler_params=pltpu.CompilerParams(
            dimension_semantics=("parallel",),
            vmem_limit_bytes=VMEM_LIMIT),
    )(*inputs)
    return out.reshape(N, H, W, Cout)


# ---------------------------------------------------------------------------
# pa embedding (Linear -> SiLU -> Linear) fused into one kernel
# ---------------------------------------------------------------------------
def _pa_embd_kernel(x_ref, w1_ref, b1_ref, w2_ref, b2_ref, o_ref):
    h = jnp.dot(x_ref[...], w1_ref[...], preferred_element_type=jnp.float32) + b1_ref[...]
    o_ref[...] = (jnp.dot(_silu(h), w2_ref[...], preferred_element_type=jnp.float32)
                  + b2_ref[...]).astype(o_ref.dtype)


def pa_embed(x, params):
    w1, b1, w2, b2 = params
    M, K = x.shape
    E = w2.shape[1]
    return pl.pallas_call(
        _pa_embd_kernel,
        out_shape=jax.ShapeDtypeStruct((M, E), jnp.float32),
        grid=(1,),
        in_specs=[pl.BlockSpec((M, K), lambda i: (0, 0)),
                  pl.BlockSpec(w1.shape, lambda i: (0, 0)),
                  pl.BlockSpec(b1.shape, lambda i: (0, 0)),
                  pl.BlockSpec(w2.shape, lambda i: (0, 0)),
                  pl.BlockSpec(b2.shape, lambda i: (0, 0))],
        out_specs=pl.BlockSpec((M, E), lambda i: (0, 0)),
        compiler_params=pltpu.CompilerParams(vmem_limit_bytes=VMEM_LIMIT),
    )(x, w1, b1, w2, b2)


# ---------------------------------------------------------------------------
# Small 1x1 conv kernel (z_feat_proj path when q_correction=False)
# ---------------------------------------------------------------------------
def _conv1x1_kernel(x_ref, w_ref, b_ref, o_ref):
    o_ref[...] = (jnp.dot(x_ref[...].astype(jnp.bfloat16), w_ref[...],
                          preferred_element_type=jnp.float32)
                  + b_ref[...]).astype(o_ref.dtype)


def conv1x1(x, w, b, out_dtype=jnp.float32):
    N, H, W, C = x.shape
    M = N * H * W
    Cout = w.shape[-1]
    out = pl.pallas_call(
        _conv1x1_kernel,
        out_shape=jax.ShapeDtypeStruct((M, Cout), out_dtype),
        grid=(1,),
        in_specs=[pl.BlockSpec((M, C), lambda i: (0, 0)),
                  pl.BlockSpec(w.shape, lambda i: (0, 0)),
                  pl.BlockSpec(b.shape, lambda i: (0, 0))],
        out_specs=pl.BlockSpec((M, Cout), lambda i: (0, 0)),
        compiler_params=pltpu.CompilerParams(vmem_limit_bytes=VMEM_LIMIT),
    )(x.reshape(M, C), w, b)
    return out.reshape(N, H, W, Cout)


# ---------------------------------------------------------------------------
# Fused sample + KL kernels (lane-dense layouts: last dim = H*W*z_dim)
# ---------------------------------------------------------------------------
def _sample_kl_kernel(ql_ref, qls_ref, pl_ref, pls_ref, eps_ref, z_ref, kl_ref):
    q_loc = ql_ref[...]
    qs = _softplus_beta(qls_ref[...])
    ps = _softplus_beta(pls_ref[...])
    z_ref[...] = q_loc + qs * eps_ref[...]
    d = q_loc - pl_ref[...]
    kl_ref[...] = (jnp.log(ps) - jnp.log(qs)
                   + (qs * qs + d * d) / (2.0 * ps * ps) - 0.5)


def sample_and_kl(q_loc, q_logscale, p_loc, p_logscale, eps):
    shp = q_loc.shape
    N = shp[0]
    L = int(np.prod(shp[1:]))
    flat = lambda a: a.reshape(N, L)
    z, kl = pl.pallas_call(
        _sample_kl_kernel,
        out_shape=(jax.ShapeDtypeStruct((N, L), jnp.float32),
                   jax.ShapeDtypeStruct((N, L), jnp.float32)),
        grid=(1,),
        in_specs=[pl.BlockSpec((N, L), lambda i: (0, 0))] * 5,
        out_specs=(pl.BlockSpec((N, L), lambda i: (0, 0)),
                   pl.BlockSpec((N, L), lambda i: (0, 0))),
        compiler_params=pltpu.CompilerParams(vmem_limit_bytes=VMEM_LIMIT),
    )(flat(q_loc), flat(q_logscale), flat(p_loc), flat(p_logscale), flat(eps))
    return z.reshape(shp), kl.reshape(shp)


def _sample_kernel(loc_ref, ls_ref, eps_ref, o_ref):
    o_ref[...] = loc_ref[...] + _softplus_beta(ls_ref[...]) * eps_ref[...]


def sample_gaussian(loc, logscale, eps):
    shp = loc.shape
    N = shp[0]
    L = int(np.prod(shp[1:]))
    out = pl.pallas_call(
        _sample_kernel,
        out_shape=jax.ShapeDtypeStruct((N, L), jnp.float32),
        grid=(1,),
        in_specs=[pl.BlockSpec((N, L), lambda i: (0, 0))] * 3,
        out_specs=pl.BlockSpec((N, L), lambda i: (0, 0)),
        compiler_params=pltpu.CompilerParams(vmem_limit_bytes=VMEM_LIMIT),
    )(loc.reshape(N, L), logscale.reshape(N, L), eps.reshape(N, L))
    return out.reshape(shp)


# ---------------------------------------------------------------------------
# Parameter construction (deterministic, in-script)
# ---------------------------------------------------------------------------
def group_matrix(C, G):
    """(C,C) matrix s.t. v @ A gives per-channel group averages of v."""
    cg = C // G
    gid = np.arange(C) // cg
    A = (gid[:, None] == gid[None, :]).astype(np.float32) / float(cg)
    return jnp.asarray(A)


def _init_dense(key, cin, cout):
    wk, bk = jax.random.split(key)
    w = (1.0 / np.sqrt(cin)) * jax.random.normal(wk, (cin, cout))
    b = 0.01 * jax.random.normal(bk, (1, cout))
    return w, b


def _init_1x1(key, cin, cout):
    wk, bk = jax.random.split(key)
    w = ((1.0 / np.sqrt(cin)) * jax.random.normal(wk, (cin, cout))).astype(jnp.bfloat16)
    b = 0.01 * jax.random.normal(bk, (1, cout))
    return w, b


def init_block(key, cfg, in_width, out_width, k, residual=True, condition=True, n_parts=1):
    """Block params in kernel-ready layout.  n_parts=2 realises the posterior
    concat as two input halves (valid because GroupNorm groups never straddle
    the halves at these widths)."""
    bneck = in_width // cfg["bottleneck"]
    G1 = max(1, min(32, in_width // 4))
    G2 = max(1, min(32, bneck // 4))
    gsz = in_width // G1
    part_c = in_width // n_parts
    assert part_c * n_parts == in_width and part_c % gsz == 0
    ks = jax.random.split(key, 6 + 2 * n_parts)
    p = {"k": k, "condition": condition, "bneck": bneck, "cout": out_width,
         "part_c": [part_c] * n_parts,
         "gn1_gamma": [], "gn1_beta": [], "gn1_A": [], "conv1_w": []}
    for j in range(n_parts):
        kga, kgb = jax.random.split(ks[2 * j])
        p["gn1_gamma"].append(jnp.ones((1, part_c), jnp.float32)
                              + 0.05 * jax.random.normal(kga, (1, part_c)))
        p["gn1_beta"].append(0.05 * jax.random.normal(kgb, (1, part_c)))
        p["gn1_A"].append(group_matrix(part_c, part_c // gsz))
        p["conv1_w"].append(((1.0 / np.sqrt(k * k * in_width))
                             * jax.random.normal(ks[2 * j + 1],
                                                 (k * k * part_c, bneck))).astype(jnp.bfloat16))
    o = 2 * n_parts
    p["conv1_b"] = 0.01 * jax.random.normal(ks[o], (1, bneck))
    if condition:
        wk, bk = jax.random.split(ks[o + 1])
        p["pa_w"] = (1.0 / np.sqrt(cfg["embd_dim"])) * jax.random.normal(
            wk, (cfg["embd_dim"], bneck))
        p["pa_b"] = 0.01 * jax.random.normal(bk, (1, bneck))
    kg2a, kg2b = jax.random.split(ks[o + 2])
    p["gn2_gamma"] = jnp.ones((1, bneck), jnp.float32) + 0.05 * jax.random.normal(kg2a, (1, bneck))
    p["gn2_beta"] = 0.05 * jax.random.normal(kg2b, (1, bneck))
    p["gn2_A"] = group_matrix(bneck, G2)
    # TODO(synk): reference zero_module()s conv2 (init-time only); randomized for a non-trivial test.
    p["conv2_w"] = ((1.0 / np.sqrt(k * k * bneck))
                    * jax.random.normal(ks[o + 3], (k * k * bneck, out_width))).astype(jnp.bfloat16)
    p["conv2_b"] = 0.01 * jax.random.normal(ks[o + 4], (1, out_width))
    if residual:
        if in_width != out_width:
            p["skip"] = "conv"
            p["skip_w"], p["skip_b"] = _init_1x1(ks[o + 5], in_width, out_width)
        else:
            p["skip"] = "id"
    else:
        p["skip"] = "none"
    return p


def init_decoder(key, cfg):
    rev_widths = cfg["widths"][::-1]
    stages = []
    for i, stage in enumerate(cfg["dec_arch"].split(",")):
        res = int(stage.split("b")[0])
        n_blocks = int(stage[stage.index("b") + 1:])
        stages += [(res, rev_widths[i], cfg["z_dim"][i]) for _ in range(n_blocks)]

    keys = jax.random.split(key, len(stages) + 3)
    blocks = []
    for i, (res, width, z_dim) in enumerate(stages):
        next_width = stages[min(len(stages) - 1, i + 1)][1]
        bkeys = jax.random.split(keys[i], 5)
        k = 3 if res > 2 else 1
        bp = {"res": res, "z_dim": z_dim, "width": width, "k": k,
              "stochastic": res <= cfg["z_max_res"]}
        bp["prior"] = init_block(bkeys[0], cfg, width, 2 * z_dim + width, k,
                                 residual=False, condition=cfg["cond_prior"])
        if bp["stochastic"]:
            bp["posterior"] = init_block(bkeys[1], cfg, 2 * width, 2 * z_dim, k,
                                         residual=False, condition=True, n_parts=2)
        bp["z_proj_w"], bp["z_proj_b"] = _init_1x1(bkeys[2], z_dim, width)
        if not cfg["q_correction"]:
            bp["z_feat_proj_w"], bp["z_feat_proj_b"] = _init_1x1(
                bkeys[3], z_dim + width, next_width)
        bp["conv"] = init_block(bkeys[4], cfg, width, next_width, k,
                                residual=True, condition=True)
        blocks.append(bp)

    all_res = sorted(set(int(s[0]) for s in stages))
    bias = {}
    bkeys = jax.random.split(keys[len(stages)], len(all_res))
    for i, res in enumerate(all_res):
        if res <= cfg["bias_max_res"]:
            # reference init is zeros; randomized (deterministically) for a non-trivial test
            bias[res] = 0.1 * jax.random.normal(bkeys[i], (1, res, res, rev_widths[i]))

    pe_w1, pe_b1 = _init_dense(keys[-2], cfg["context_dim"], cfg["embd_dim"])
    pe_w2, pe_b2 = _init_dense(keys[-1], cfg["embd_dim"], cfg["embd_dim"])
    return {"cfg": cfg, "blocks": blocks, "bias": bias, "all_res": all_res,
            "pa_embd": (pe_w1, pe_b1, pe_w2, pe_b2)}


# ---------------------------------------------------------------------------
# Decoder.forward
# ---------------------------------------------------------------------------
def decoder_forward(params, parents, x=None, t=None, abduct=False, latents=None, rng=None):
    """parents: (N,1,1,context_dim) NHWC.  x: optional dict {res: (N,res,res,width)} NHWC."""
    cfg = params["cfg"]
    bias = params["bias"]
    all_res = params["all_res"]
    N = parents.shape[0]

    h = jnp.broadcast_to(bias[all_res[0]], (N,) + bias[all_res[0]].shape[1:])
    z = h
    pa = pa_embed(parents[:, 0, 0, :], params["pa_embd"])       # Linear->SiLU->Linear fused
    pa_sto = pa_det = pa

    stats = []
    rngs = jax.random.split(rng, len(params["blocks"])) if rng is not None else None
    b = 0.0
    for i, bp in enumerate(params["blocks"]):
        res = bp["res"]
        zd = bp["z_dim"]
        if h.shape[1] < res:
            b = bias[res] if res in bias else 0.0
            scale = res // h.shape[1]
            # TODO(synk): nearest-upsample+bias stays a single XLA fusion; folding it into the
            # consuming conv's index_map is blocked by the full-res bias add before GN stats.
            h = b + jnp.repeat(jnp.repeat(h, scale, axis=1), scale, axis=2)
        if cfg["q_correction"]:
            p_input = h
        else:
            if z.shape[1] < res:
                scale = res // z.shape[1]
                p_input = b + jnp.repeat(jnp.repeat(z, scale, axis=1), scale, axis=2)
            else:
                p_input = z

        # forward_prior: one fused whole-Block call
        pz = fused_block(bp["prior"], x_parts=[p_input], pa=pa_sto)
        p_loc = pz[..., :zd]
        p_logscale = pz[..., zd:2 * zd]
        p_feat = pz[..., 2 * zd:]
        if t is not None:
            p_logscale = p_logscale + jnp.log(jnp.asarray(t, jnp.float32))

        if bp["stochastic"]:
            if x is not None:
                # forward_posterior: the cat([h, x[res]]) is realized as two in-VMEM parts
                q = fused_block(bp["posterior"], x_parts=[h, x[res]], pa=pa)
                q_loc, q_logscale = q[..., :zd], q[..., zd:]
                if t is not None:
                    q_logscale = q_logscale + jnp.log(jnp.asarray(t, jnp.float32))
                eps = jax.random.normal(rngs[i], q_loc.shape, jnp.float32)
                z, kl = sample_and_kl(q_loc, q_logscale, p_loc, p_logscale, eps)
                stat = dict(kl=kl)
                if abduct:
                    stat.update(dict(z=(dict(z=z, q_loc=q_loc, q_logscale=q_logscale)
                                        if cfg["cond_prior"] else z)))
                stats.append(stat)
            else:
                if latents is not None and i < len(latents) and latents[i] is not None:
                    z = latents[i]
                else:
                    eps = jax.random.normal(rngs[i], p_loc.shape, jnp.float32)
                    z = sample_gaussian(p_loc, p_logscale, eps)
                    if abduct and cfg["cond_prior"]:
                        stats.append(dict(z=dict(p_loc=p_loc, p_logscale=p_logscale)))
        else:
            z = p_loc

        # h + p_feat + z_proj(z) and the whole conv Block fused in one call; h emitted bf16
        h = fused_block(bp["conv"], pa=pa_det,
                        prologue=(h, p_feat, z, bp["z_proj_w"], bp["z_proj_b"]),
                        out_dtype=jnp.bfloat16)
        if not cfg["q_correction"]:
            if i + 1 < len(params["blocks"]):
                z = conv1x1(jnp.concatenate([z, p_feat], axis=-1),
                            bp["z_feat_proj_w"], bp["z_feat_proj_b"])
    return h.astype(jnp.float32), stats


# ---------------------------------------------------------------------------
# Demo
# ---------------------------------------------------------------------------
CONFIG = dict(
    widths=[16, 32],          # encoder widths; decoder uses them reversed -> [32, 16]
    dec_arch="8b1,16b1",      # one block at 8x8 (width 32), one at 16x16 (width 16)
    z_dim=[4, 4],
    z_max_res=16,
    bias_max_res=16,
    cond_prior=False,
    q_correction=True,
    bottleneck=4,
    p_dropout=0.0,
    embd_dim=32,
    context_dim=8,
)

if __name__ == "__main__":
    key = jax.random.PRNGKey(0)
    pkey, ckey, x8key, x16key, skey = jax.random.split(key, 5)

    params = init_decoder(pkey, CONFIG)

    N = 2
    parents = jax.random.normal(ckey, (N, 1, 1, CONFIG["context_dim"]), jnp.float32)
    # "encoder" features per resolution (NHWC), channel counts match block widths
    x = {8: 0.1 * jax.random.normal(x8key, (N, 8, 8, 32), jnp.float32),
         16: 0.1 * jax.random.normal(x16key, (N, 16, 16, 16), jnp.float32)}

    h, stats = decoder_forward(params, parents, x=x, rng=skey)
    h = jax.block_until_ready(h)
    for s in stats:
        jax.block_until_ready(s["kl"])

    assert h.shape == (N, 16, 16, 16)
    assert len(stats) == 2
    assert bool(jnp.all(jnp.isfinite(h)))
    assert all(bool(jnp.all(jnp.isfinite(s["kl"]))) for s in stats)
    print("KERNEL_OK")
</pallas_src>

<mosaic_0001>
module attributes {stable_mosaic.version = 11 : i64} {
  func.func @_pa_embd_kernel(%arg0: i32, %arg1: memref<2x8xf32, #tpu.memory_space<vmem>>, %arg2: memref<8x32xf32, #tpu.memory_space<vmem>>, %arg3: memref<1x32xf32, #tpu.memory_space<vmem>>, %arg4: memref<32x32xf32, #tpu.memory_space<vmem>>, %arg5: memref<1x32xf32, #tpu.memory_space<vmem>>, %arg6: memref<2x32xf32, #tpu.memory_space<vmem>>) attributes {dimension_semantics = [#tpu.dimension_semantics<arbitrary>], iteration_bounds = array<i64: 1>, scalar_prefetch = 0 : i64, scratch_operands = 0 : i64, tpu.core_type = #tpu.core_type<tc>, window_params = [{pipeline_mode = #tpu.pipeline_mode<synchronous>, transform_indices = @transform_0, window_bounds = array<i64: 2, 8>}, {pipeline_mode = #tpu.pipeline_mode<synchronous>, transform_indices = @transform_1, window_bounds = array<i64: 8, 32>}, {pipeline_mode = #tpu.pipeline_mode<synchronous>, transform_indices = @transform_2, window_bounds = array<i64: 1, 32>}, {pipeline_mode = #tpu.pipeline_mode<synchronous>, transform_indices = @transform_3, window_bounds = array<i64: 32, 32>}, {pipeline_mode = #tpu.pipeline_mode<synchronous>, transform_indices = @transform_4, window_bounds = array<i64: 1, 32>}, {pipeline_mode = #tpu.pipeline_mode<synchronous>, transform_indices = @transform_5, window_bounds = array<i64: 2, 32>}]} {
    %c0 = arith.constant 0 : index
    %c0_0 = arith.constant 0 : index
    %0 = vector.load %arg1[%c0, %c0_0] : memref<2x8xf32, #tpu.memory_space<vmem>>, vector<2x8xf32>
    %c0_1 = arith.constant 0 : index
    %c0_2 = arith.constant 0 : index
    %1 = vector.load %arg2[%c0_1, %c0_2] : memref<8x32xf32, #tpu.memory_space<vmem>>, vector<8x32xf32>
    %cst = arith.constant dense<0.000000e+00> : vector<2x32xf32>
    %2 = tpu.matmul %0, %1, %cst {dimension_numbers = #tpu.dot_dimension_numbers<[1], [0], [0], [1], [0, 0, 1, 1], [], []>} : vector<2x8xf32>, vector<8x32xf32>, vector<2x32xf32> -> vector<2x32xf32>
    %c0_3 = arith.constant 0 : index
    %c0_4 = arith.constant 0 : index
    %3 = vector.load %arg3[%c0_3, %c0_4] : memref<1x32xf32, #tpu.memory_space<vmem>>, vector<1x32xf32>
    %4 = vector.broadcast %3 : vector<1x32xf32> to vector<2x32xf32>
    %5 = arith.addf %2, %4 : vector<2x32xf32>
    %6 = arith.negf %5 : vector<2x32xf32>
    %7 = math.exp %6 : vector<2x32xf32>
    %cst_5 = arith.constant 1.000000e+00 : f32
    %8 = vector.broadcast %cst_5 : f32 to vector<2x32xf32>
    %9 = arith.addf %8, %7 : vector<2x32xf32>
    %10 = arith.divf %8, %9 : vector<2x32xf32>
    %11 = arith.mulf %5, %10 : vector<2x32xf32>
    %c0_6 = arith.constant 0 : index
    %c0_7 = arith.constant 0 : index
    %12 = vector.load %arg4[%c0_6, %c0_7] : memref<32x32xf32, #tpu.memory_space<vmem>>, vector<32x32xf32>
    %cst_8 = arith.constant dense<0.000000e+00> : vector<2x32xf32>
    %13 = tpu.matmul %11, %12, %cst_8 {dimension_numbers = #tpu.dot_dimension_numbers<[1], [0], [0], [1], [0, 0, 1, 1], [], []>} : vector<2x32xf32>, vector<32x32xf32>, vector<2x32xf32> -> vector<2x32xf32>
    %c0_9 = arith.constant 0 : index
    %c0_10 = arith.constant 0 : index
    %14 = vector.load %arg5[%c0_9, %c0_10] : memref<1x32xf32, #tpu.memory_space<vmem>>, vector<1x32xf32>
    %15 = vector.broadcast %14 : vector<1x32xf32> to vector<2x32xf32>
    %16 = arith.addf %13, %15 : vector<2x32xf32>
    %c0_11 = arith.constant 0 : index
    %c0_12 = arith.constant 0 : index
    %17 = vector.load %arg6[%c0_11, %c0_12] : memref<2x32xf32, #tpu.memory_space<vmem>>, vector<2x32xf32>
    tpu.vector_store %arg6[%c0_11, %c0_12], %16 {strides = array<i32>} : memref<2x32xf32, #tpu.memory_space<vmem>>, vector<2x32xf32>,
    return
  }
  func.func @transform_0(%arg0: i32) -> (i32, i32) {
    %c0_i32 = arith.constant 0 : i32
    %c0_i32_0 = arith.constant 0 : i32
    %c0_i32_1 = arith.constant 0 : i32
    return %c0_i32, %c0_i32_0 : i32, i32
  }
  func.func @transform_1(%arg0: i32) -> (i32, i32) {
    %c0_i32 = arith.constant 0 : i32
    %c0_i32_0 = arith.constant 0 : i32
    %c0_i32_1 = arith.constant 0 : i32
    return %c0_i32, %c0_i32_0 : i32, i32
  }
  func.func @transform_2(%arg0: i32) -> (i32, i32) {
    %c0_i32 = arith.constant 0 : i32
    %c0_i32_0 = arith.constant 0 : i32
    %c0_i32_1 = arith.constant 0 : i32
    return %c0_i32, %c0_i32_0 : i32, i32
  }
  func.func @transform_3(%arg0: i32) -> (i32, i32) {
    %c0_i32 = arith.constant 0 : i32
    %c0_i32_0 = arith.constant 0 : i32
    %c0_i32_1 = arith.constant 0 : i32
    return %c0_i32, %c0_i32_0 : i32, i32
  }
  func.func @transform_4(%arg0: i32) -> (i32, i32) {
    %c0_i32 = arith.constant 0 : i32
    %c0_i32_0 = arith.constant 0 : i32
    %c0_i32_1 = arith.constant 0 : i32
    return %c0_i32, %c0_i32_0 : i32, i32
  }
  func.func @transform_5(%arg0: i32) -> (i32, i32) {
    %c0_i32 = arith.constant 0 : i32
    %c0_i32_0 = arith.constant 0 : i32
    %c0_i32_1 = arith.constant 0 : i32
    return %c0_i32, %c0_i32_0 : i32, i32
  }
}

</mosaic_0001>

<bundles_post_ra>
// kernel: tpu_custom_call.1
= control target key start
LH: loop header
LB: loop body
LE: loop exit
PB: predicated region body
PF: predicated region fallthrough
CT: control target
= control target key end

     0   :  { %10 = vsyncpa [#allocation3], 0  ;;  %s485_s0 = inlined_call_operand.hbm [shape: f32[2,8], index: 0, kind: input, shape index: {}]   ;;  %s486_s1 = inlined_call_operand.hbm [shape: f32[8,32], index: 1, kind: input, shape index: {}]   ;;  %s487_s2 = inlined_call_operand.vmem [shape: f32[1,32], index: 2, kind: input, shape index: {}]   ;;  %s488_s3 = inlined_call_operand.hbm [shape: f32[32,32], index: 3, kind: input, shape index: {}]   ;;  %s489_s4 = inlined_call_operand.vmem [shape: f32[1,32], index: 4, kind: input, shape index: {}]   ;;  %s490_s5 = inlined_call_operand.hbm [shape: f32[2,32], index: 5, kind: output, shape index: {}]  }
   0x1   :  { %11 = vsyncpa [#allocation6], 0 }
   0x2   :  { %12 = vsyncpa [#allocation4], 0  ;;  %s392_s18 = smov [#allocation5]   ;;  %s393_s20 = smov [#allocation2]  }
   0x3   :  { %s29_s19 = sshll.u32 %s392_s18, 4  ;;  %s19_s21 = sshll.u32 %s393_s20, 4  ;;  %s30_s19 = int_to_ptr.vmem [resolvable:$true] %s29_s19  ;;  %s20_s21 = int_to_ptr.vmem [resolvable:$true] %s19_s21 }
   0x4   :  { %s298_s24 = scalar_lea.hbm %s486_s1, 128 }
   0x5   :  { %p299_p0 = scmp.ne.s32.totalorder %s486_s1, %s298_s24  ;;  %p302_p1 = scmp.lt.u32.totalorder %s298_s24, %s486_s1 }
   0x7   :  { %p304_p2 = pnand %p302_p1, %p299_p0 }
   0x9   :  { %307 = shalt.err (!%p304_p2)
}
   0xa   :  { %s308_s29 = scalar_lea.vmem %s30_s19, 128  ;;  %p313_p4 = scmp.lt.s32.totalorder %s30_s19, %s30_s19 }
   0xb   :  { %p309_p3 = scmp.ne.s32.totalorder %s30_s19, %s308_s29  ;;  %p314_p5 = scmp.lt.s32.totalorder %s308_s29, %s308_s29 }
   0xd   :  { %p315_p6 = por %p314_p5, %p313_p4 }
   0xf   :  { %p316_p7 = pnand %p315_p6, %p309_p3 }
  0x11   :  { %319 = shalt.err (!%p316_p7)
}
  0x12   :  { %32 = dma.hbm_to_vmem [thread:$0]  %s486_s1, 128, %s30_s19, [#allocation6]  }
  0x13   :  { %s320_s9 = scalar_lea.hbm %s485_s0, 32 }
  0x14   :  { %p321_p8 = scmp.ne.s32.totalorder %s485_s0, %s320_s9  ;;  %p324_p9 = scmp.lt.u32.totalorder %s320_s9, %s485_s0 }
  0x16   :  { %p326_p10 = pnand %p324_p9, %p321_p8 }
  0x18   :  { %329 = shalt.err (!%p326_p10)
}
  0x19   :  { %s330_s14 = scalar_lea.vmem %s20_s21, 32  ;;  %p335_p12 = scmp.lt.s32.totalorder %s20_s21, %s20_s21 }
  0x1a   :  { %p331_p11 = scmp.ne.s32.totalorder %s20_s21, %s330_s14  ;;  %p336_p13 = scmp.lt.s32.totalorder %s330_s14, %s330_s14 }
  0x1c   :  { %p337_p0 = por %p336_p13, %p335_p12 }
  0x1e   :  { %p338_p1 = pnand %p337_p0, %p331_p11 }
  0x20   :  { %341 = shalt.err (!%p338_p1)
}
  0x21   :  { %22 = dma.hbm_to_vmem [thread:$0]  %s485_s0, 32, %s20_s21, [#allocation3]  }
  0x22   :  { %s394_s16 = smov [#allocation7]   ;;  %s342_s20 = scalar_lea.hbm %s488_s3, 512 }
  0x23   :  { %s40_s17 = sshll.u32 %s394_s16, 4  ;;  %p343_p2 = scmp.ne.s32.totalorder %s488_s3, %s342_s20  ;;  %s41_s17 = int_to_ptr.vmem [resolvable:$true] %s40_s17 }
  0x24   :  { %p346_p3 = scmp.lt.u32.totalorder %s342_s20, %s488_s3 }
  0x26   :  { %p348_p4 = pnand %p346_p3, %p343_p2 }
  0x28   :  { %351 = shalt.err (!%p348_p4)
}
  0x29   :  { %s352_s26 = scalar_lea.vmem %s41_s17, 512  ;;  %p357_p6 = scmp.lt.s32.totalorder %s41_s17, %s41_s17 }
  0x2a   :  { %p353_p5 = scmp.ne.s32.totalorder %s41_s17, %s352_s26  ;;  %p358_p7 = scmp.lt.s32.totalorder %s352_s26, %s352_s26 }
  0x2c   :  { %p359_p8 = por %p358_p7, %p357_p6 }
  0x2e   :  { %p360_p9 = pnand %p359_p8, %p353_p5 }
  0x30   :  { %363 = shalt.err (!%p360_p9)
}
  0x31   :  { %s395_s0 = smov 128   ;;  %s396_s21 = smov 8  }
  0x32   :  { %46 = dma.hbm_to_vmem [thread:$0]  %s488_s3, 512, %s41_s17, [#allocation6], %s395_s0, %s395_s0, %s396_s21  }
  0x33   :  { %386 = dma.done.wait [#allocation3], 32  }
  0x34   :  { %387 = vsyncadd [#allocation3], 4294967264 }
  0x35   :  { %388 = dma.done.wait [#allocation6], 640  }
  0x36   :  { %389 = vsyncadd [#allocation6], 4294966656  ;;  %v397_v0 = vmov 0.0   ;;  %vm398_vm0 = vmmov 0   ;;  %vm67_vm1 = vcmask 64512   ;;  %v59_v1 = vld [vmem:[#allocation5] sm:$0xff] }
  0x37   :  { %263 = vmatprep.subr.mxu0 %v397_v0  ;;  %265 = vmatprep.mubr.msk.f32.mxu0 %vm398_vm0, %v397_v0  ;;  %v58_v2 = vld [vmem:[#allocation2] sm:$0x3]  ;;  %v148_v3 = vld [vmem:[#allocation7] sm:$0xff]  ;;  %v149_v4 = vld [vmem:[#allocation7 + $0x8] sm:$0xff]  ;;  %v399_v6 = vmov 0.0|0.0   ;;  %vm159_vm2 = vcmask 261120  }
  0x38   :  { %276 = vmatprep.mubr.msk.f32.mxu1 %vm398_vm0, %v397_v0  ;;  %264 = vmatpush3.msra.mxu0 %v59_v1  ;;  %v280_v5 = vpack.c.bf16 %v149_v4, %v148_v3  ;;  %v150_v7 = vld [vmem:[#allocation7 + $0x10] sm:$0xff]  ;;  %v151_v8 = vld [vmem:[#allocation7 + $0x18] sm:$0xff]  ;;  %s400_s7 = smov [#allocation8]   ;;  %vm233_vm3 = vcmask 254976  }
  0x39   :  { %266 = vmatmul.mubr.msk.f32.vlgmr.msra.gmra.mrb[0].mxu0 %vm67_vm1, %v58_v2  ;;  %279 = vmatprep.subr.bf16.mxu1 %v399_v6  ;;  %v283_v9 = vpack.c.bf16 %v151_v8, %v150_v7  ;;  %v251_v10 = vld [vmem:[%s487_s2] ss:$0 sm:$0xff]  ;;  %s241_s8 = sshll.u32 %s400_s7, 4  ;;  %s242_s8 = int_to_ptr.vmem [resolvable:$true] %s241_s8 }
  0x3a   :  { %281 = vmatpush3.bf16.msra.mxu1 %v280_v5  ;;  %v254_v19 = vld [vmem:[%s489_s4] ss:$0 sm:$0xff]  ;;  %s364_s2 = scalar_lea.vmem %s242_s8, 32  ;;  %p369_p11 = scmp.lt.s32.totalorder %s242_s8, %s242_s8 }
  0x3b   :  { %282 = vmatprep.subr.bf16.mxu1 %v399_v6  ;;  %p365_p10 = scmp.ne.s32.totalorder %s242_s8, %s364_s2  ;;  %p370_p12 = scmp.lt.s32.totalorder %s364_s2, %s364_s2 }
  0x3d   :  { %p371_p13 = por %p370_p12, %p369_p11 }
  0x3e   :  { %284 = vmatpush3.bf16.msra.mxu1 %v283_v9 }
  0x3f   :  { %p372_p0 = pnand %p371_p13, %p365_p10 }
 0x10c   :  { %v137_v11 = vpop.f32.mrb[0].mxu0 }
 0x10d   :  { %v138_v12 = vadd.f32 %v251_v10, %v137_v11  ;;  %v267_v13 = vpop.f32.mrb[1].mxu0 }
 0x10f   :  { %v253_v14 = vmul.f32 -1.442695, %v138_v12 }
 0x111   :  { %294 = vpow2.f32 %v253_v14 }
 0x11b   :  { %v295_v15 = vpop.eup %294 }
 0x11c   :  { %v144_v16 = vadd.f32 1.0, %v295_v15 }
 0x11e   :  { %296 = vrcp.f32 %v144_v16 }
 0x128   :  { %v297_v17 = vpop.eup %296 }
 0x129   :  { %v147_v18 = vmul.f32 %v297_v17, %v138_v12 }
 0x12b   :  { %277 = vmatmul.mubr.msk.f32.vlgmr.msra.gmra.mrb[0].mxu1 %vm159_vm2, %v147_v18 }
 0x1fe   :  { %v229_v20 = vpop.f32.mrb[0].mxu1 }
 0x1ff   :  { %v230_v21 = vadd.f32 %v254_v19, %v229_v20  ;;  %v278_v22 = vpop.f32.mrb[1].mxu1 }
 0x201   :  { %234 = vst.msk [vmem:[#allocation8] sm:$0x3] %vm233_vm3, %v230_v21 }
 0x202   :  { %375 = shalt.err (!%p372_p0)
}
 0x203   :  { %s376_s11 = scalar_lea.hbm %s490_s5, 32 }
 0x204   :  { %p377_p1 = scmp.ne.s32.totalorder %s490_s5, %s376_s11  ;;  %p380_p2 = scmp.lt.u32.totalorder %s376_s11, %s490_s5 }
 0x206   :  { %p382_p3 = pnand %p380_p2, %p377_p1 }
 0x208   :  { %385 = shalt.err (!%p382_p3)
}
 0x209   :  { %244 = dma.vmem_to_hbm [thread:$0]  %s242_s8, 32, %s490_s5, [#allocation4]  }
 0x20a   :  { %390 = dma.done.wait [#allocation4], 32  }
 0x20b   :  { %391 = vsyncadd [#allocation4], 4294967264 }
 0x20c   :  { %248 = vsyncpa [#allocation3], 1 }
 0x20d   :  { %249 = vsyncpa [#allocation6], 1 }
 0x20e   :  { %250 = vsyncpa [#allocation4], 1 }

</bundles_post_ra>
